<compile_context>
chip_gen: v6e
topology: v6e:2x2x1
jax: 0.10.0
libtpu: 0.0.40
codegen_flags: <defaults>
</compile_context>

<pallas_src>
import functools
import math

import jax
import jax.numpy as jnp
from jax.experimental import pallas as pl
from jax.experimental.pallas import tpu as pltpu

IN_DIM, H1, H2, OUT_DIM = 28 * 28, 200, 84, 10
# Lane-dense (multiple-of-128) padded hidden dims for the MXU. Output stays 10.
H1_PAD, H2_PAD = 256, 128


def _mlp_kernel(x_ref, w1_ref, b1_ref, w2_ref, b2_ref, w3_ref, b3_ref, o_ref):
    # One batch tile per grid step; weights/biases have constant index_maps so
    # they stay VMEM-resident across grid steps — per-step HBM traffic is just
    # the f32 x tile in and the (tb, 10) f32 output tile out.
    x = x_ref[...].astype(w1_ref.dtype)                               # cast on VPU, no extra HBM pass
    h = jnp.dot(x, w1_ref[...], preferred_element_type=jnp.float32)  # (tb, 256) f32 acc
    h = jnp.maximum(h + b1_ref[...], 0.0)                             # ReLU in f32 (VPU)
    h = jnp.dot(h.astype(w2_ref.dtype), w2_ref[...],
                preferred_element_type=jnp.float32)                   # (tb, 128)
    h = jnp.maximum(h + b2_ref[...], 0.0)                             # ReLU
    h = jnp.dot(h.astype(w3_ref.dtype), w3_ref[...],
                preferred_element_type=jnp.float32)                   # (tb, 10)
    o_ref[...] = jax.nn.sigmoid(h + b3_ref[...])                      # Sigmoid in f32 (EUP)


def prepare_params(params, compute_dtype=jnp.bfloat16):
    """One-time pad + cast of the weights/biases (hoisted out of the forward).

    Padded hidden units see zero weights + zero bias -> ReLU(0) = 0, so they
    contribute nothing; the output dim is left at 10 (no padded columns).
    """
    w1, b1, w2, b2, w3, b3 = params
    w1p = jnp.pad(w1, ((0, 0), (0, H1_PAD - H1))).astype(compute_dtype)
    b1p = jnp.pad(b1, ((0, 0), (0, H1_PAD - H1))).astype(jnp.float32)
    w2p = jnp.pad(w2, ((0, H1_PAD - H1), (0, H2_PAD - H2))).astype(compute_dtype)
    b2p = jnp.pad(b2, ((0, 0), (0, H2_PAD - H2))).astype(jnp.float32)
    w3p = jnp.pad(w3, ((0, H2_PAD - H2), (0, 0))).astype(compute_dtype)
    b3p = b3.astype(jnp.float32)
    return (w1p, b1p, w2p, b2p, w3p, b3p)


@functools.partial(jax.jit, static_argnames=("tile_b",))
def mlp2_forward(x_nchw, prepared_params, *, tile_b=1024):
    """x_nchw: (B, 1, 28, 28) float32 -> (B, 10) float32."""
    b = x_nchw.shape[0]
    x = x_nchw.reshape(b, -1)  # == torch x.view(x.shape[0], -1); stays f32, no copy pass
    w1p, b1p, w2p, b2p, w3p, b3p = prepared_params

    # Batch tile: tile_b (multiple of 8) when the batch is large, otherwise a
    # single full-batch tile (block dim == array dim is always legal). No
    # batch padding — Pallas masks the ragged last tile's output writeback.
    tb = min(tile_b, b)
    grid = (pl.cdiv(b, tb),)

    wsize = jnp.dtype(w1p.dtype).itemsize
    weight_elems = IN_DIM * H1_PAD + H1_PAD * H2_PAD + H2_PAD * OUT_DIM
    cost = pl.CostEstimate(
        flops=2 * b * weight_elems,
        transcendentals=b * OUT_DIM,
        bytes_accessed=b * IN_DIM * 4 + weight_elems * wsize + b * OUT_DIM * 4,
    )

    out = pl.pallas_call(
        _mlp_kernel,
        out_shape=jax.ShapeDtypeStruct((b, OUT_DIM), jnp.float32),
        grid=grid,
        in_specs=[
            pl.BlockSpec((tb, IN_DIM), lambda i: (i, 0)),      # x: streamed f32 per tile
            pl.BlockSpec((IN_DIM, H1_PAD), lambda i: (0, 0)),  # weights/biases resident
            pl.BlockSpec((1, H1_PAD), lambda i: (0, 0)),
            pl.BlockSpec((H1_PAD, H2_PAD), lambda i: (0, 0)),
            pl.BlockSpec((1, H2_PAD), lambda i: (0, 0)),
            pl.BlockSpec((H2_PAD, OUT_DIM), lambda i: (0, 0)),
            pl.BlockSpec((1, OUT_DIM), lambda i: (0, 0)),
        ],
        out_specs=pl.BlockSpec((tb, OUT_DIM), lambda i: (i, 0)),
        compiler_params=pltpu.CompilerParams(
            # Batch tiles are independent -> shard across v7x's 2 TensorCores.
            dimension_semantics=("parallel",),
            # tb=1024 needs ~14 MiB (2x3.1 MiB f32 x tiles + weights +
            # intermediates); raise above v5e's 16 MiB default scoped limit
            # while staying under v7x's 64 MiB physical per-TC VMEM.
            vmem_limit_bytes=48 * 1024 * 1024,
        ),
        cost_estimate=cost,
    )(x, w1p, b1p, w2p, b2p, w3p, b3p)

    return out  # already (B, 10) f32 — no wrapper slice


def init_params(key):
    """Deterministic init matching the PyTorch module:
       weights: xavier_uniform_, biases: uniform_(0, 1)."""
    def xavier_uniform(k, fan_in, fan_out):
        # torch stores W as (out, in); we store W.T as (in, out). Same bound.
        a = math.sqrt(6.0 / (fan_in + fan_out))
        return jax.random.uniform(k, (fan_in, fan_out), jnp.float32, -a, a)

    ks = jax.random.split(key, 6)
    w1 = xavier_uniform(ks[0], IN_DIM, H1)
    b1 = jax.random.uniform(ks[1], (1, H1), jnp.float32, 0.0, 1.0)
    w2 = xavier_uniform(ks[2], H1, H2)
    b2 = jax.random.uniform(ks[3], (1, H2), jnp.float32, 0.0, 1.0)
    w3 = xavier_uniform(ks[4], H2, OUT_DIM)
    b3 = jax.random.uniform(ks[5], (1, OUT_DIM), jnp.float32, 0.0, 1.0)
    return (w1, b1, w2, b2, w3, b3)


def _reference(x_nchw, params):
    """Pure-JAX f32 reference for a correctness sanity check."""
    w1, b1, w2, b2, w3, b3 = params
    x = x_nchw.reshape(x_nchw.shape[0], -1)
    h = jnp.maximum(x @ w1 + b1, 0.0)
    h = jnp.maximum(h @ w2 + b2, 0.0)
    return jax.nn.sigmoid(h @ w3 + b3)


if __name__ == "__main__":
    key = jax.random.PRNGKey(0)
    k_x, k_x2, k_p = jax.random.split(key, 3)

    batch = 2
    x = jax.random.normal(k_x, (batch, 1, 28, 28), jnp.float32)  # NCHW MNIST-like
    params = init_params(k_p)
    ref = _reference(x, params)

    # f32 compute path: tight check of the padded/tiled kernel logic.
    p_f32 = prepare_params(params, compute_dtype=jnp.float32)
    out_f32 = jax.block_until_ready(mlp2_forward(x, p_f32))
    assert out_f32.shape == (batch, OUT_DIM)
    assert jnp.allclose(out_f32, ref, atol=1e-4, rtol=1e-4), "f32 mismatch vs reference"

    # bf16 MXU-operand path (default, fast): loose tolerance vs f32 reference.
    p_bf16 = prepare_params(params, compute_dtype=jnp.bfloat16)
    out_bf16 = jax.block_until_ready(mlp2_forward(x, p_bf16))
    assert out_bf16.shape == (batch, OUT_DIM)
    assert jnp.allclose(out_bf16, ref, atol=5e-2), "bf16 mismatch vs reference"

    # Multi-tile grid with a ragged last tile (20 rows, tile of 8 -> grid 3):
    # exercises the pl.cdiv / masked-writeback path at small cost.
    batch2 = 20
    x2 = jax.random.normal(k_x2, (batch2, 1, 28, 28), jnp.float32)
    ref2 = _reference(x2, params)
    out2 = jax.block_until_ready(mlp2_forward(x2, p_f32, tile_b=8))
    assert out2.shape == (batch2, OUT_DIM)
    assert jnp.allclose(out2, ref2, atol=1e-4, rtol=1e-4), "ragged-tile mismatch vs reference"

    print("KERNEL_OK")
</pallas_src>

<mosaic_0001>
module attributes {stable_mosaic.version = 11 : i64} {
  func.func @_mlp_kernel(%arg0: i32, %arg1: memref<2x784xf32, #tpu.memory_space<vmem>>, %arg2: memref<784x256xf32, #tpu.memory_space<vmem>>, %arg3: memref<1x256xf32, #tpu.memory_space<vmem>>, %arg4: memref<256x128xf32, #tpu.memory_space<vmem>>, %arg5: memref<1x128xf32, #tpu.memory_space<vmem>>, %arg6: memref<128x10xf32, #tpu.memory_space<vmem>>, %arg7: memref<1x10xf32, #tpu.memory_space<vmem>>, %arg8: memref<2x10xf32, #tpu.memory_space<vmem>>) attributes {dimension_semantics = [#tpu.dimension_semantics<parallel>], iteration_bounds = array<i64: 1>, scalar_prefetch = 0 : i64, scratch_operands = 0 : i64, tpu.core_type = #tpu.core_type<tc>, window_params = [{transform_indices = @transform_0, window_bounds = array<i64: 2, 784>}, {pipeline_mode = #tpu.pipeline_mode<synchronous>, transform_indices = @transform_1, window_bounds = array<i64: 784, 256>}, {pipeline_mode = #tpu.pipeline_mode<synchronous>, transform_indices = @transform_2, window_bounds = array<i64: 1, 256>}, {pipeline_mode = #tpu.pipeline_mode<synchronous>, transform_indices = @transform_3, window_bounds = array<i64: 256, 128>}, {pipeline_mode = #tpu.pipeline_mode<synchronous>, transform_indices = @transform_4, window_bounds = array<i64: 1, 128>}, {pipeline_mode = #tpu.pipeline_mode<synchronous>, transform_indices = @transform_5, window_bounds = array<i64: 128, 10>}, {pipeline_mode = #tpu.pipeline_mode<synchronous>, transform_indices = @transform_6, window_bounds = array<i64: 1, 10>}, {transform_indices = @transform_7, window_bounds = array<i64: 2, 10>}]} {
    %c0 = arith.constant 0 : index
    %c0_0 = arith.constant 0 : index
    %0 = vector.load %arg1[%c0, %c0_0] : memref<2x784xf32, #tpu.memory_space<vmem>>, vector<2x784xf32>
    %c0_1 = arith.constant 0 : index
    %c0_2 = arith.constant 0 : index
    %1 = vector.load %arg2[%c0_1, %c0_2] : memref<784x256xf32, #tpu.memory_space<vmem>>, vector<784x256xf32>
    %cst = arith.constant dense<0.000000e+00> : vector<2x256xf32>
    %2 = tpu.matmul %0, %1, %cst {dimension_numbers = #tpu.dot_dimension_numbers<[1], [0], [0], [1], [0, 0, 1, 1], [], []>} : vector<2x784xf32>, vector<784x256xf32>, vector<2x256xf32> -> vector<2x256xf32>
    %c0_3 = arith.constant 0 : index
    %c0_4 = arith.constant 0 : index
    %3 = vector.load %arg3[%c0_3, %c0_4] : memref<1x256xf32, #tpu.memory_space<vmem>>, vector<1x256xf32>
    %4 = vector.broadcast %3 : vector<1x256xf32> to vector<2x256xf32>
    %5 = arith.addf %2, %4 : vector<2x256xf32>
    %cst_5 = arith.constant 0.000000e+00 : f32
    %6 = vector.broadcast %cst_5 : f32 to vector<2x256xf32>
    %7 = arith.maximumf %5, %6 : vector<2x256xf32>
    %c0_6 = arith.constant 0 : index
    %c0_7 = arith.constant 0 : index
    %8 = vector.load %arg4[%c0_6, %c0_7] : memref<256x128xf32, #tpu.memory_space<vmem>>, vector<256x128xf32>
    %cst_8 = arith.constant dense<0.000000e+00> : vector<2x128xf32>
    %9 = tpu.matmul %7, %8, %cst_8 {dimension_numbers = #tpu.dot_dimension_numbers<[1], [0], [0], [1], [0, 0, 1, 1], [], []>} : vector<2x256xf32>, vector<256x128xf32>, vector<2x128xf32> -> vector<2x128xf32>
    %c0_9 = arith.constant 0 : index
    %c0_10 = arith.constant 0 : index
    %10 = vector.load %arg5[%c0_9, %c0_10] : memref<1x128xf32, #tpu.memory_space<vmem>>, vector<1x128xf32>
    %11 = vector.broadcast %10 : vector<1x128xf32> to vector<2x128xf32>
    %12 = arith.addf %9, %11 : vector<2x128xf32>
    %cst_11 = arith.constant 0.000000e+00 : f32
    %13 = vector.broadcast %cst_11 : f32 to vector<2x128xf32>
    %14 = arith.maximumf %12, %13 : vector<2x128xf32>
    %c0_12 = arith.constant 0 : index
    %c0_13 = arith.constant 0 : index
    %15 = vector.load %arg6[%c0_12, %c0_13] : memref<128x10xf32, #tpu.memory_space<vmem>>, vector<128x10xf32>
    %cst_14 = arith.constant dense<0.000000e+00> : vector<2x10xf32>
    %16 = tpu.matmul %14, %15, %cst_14 {dimension_numbers = #tpu.dot_dimension_numbers<[1], [0], [0], [1], [0, 0, 1, 1], [], []>} : vector<2x128xf32>, vector<128x10xf32>, vector<2x10xf32> -> vector<2x10xf32>
    %c0_15 = arith.constant 0 : index
    %c0_16 = arith.constant 0 : index
    %17 = vector.load %arg7[%c0_15, %c0_16] : memref<1x10xf32, #tpu.memory_space<vmem>>, vector<1x10xf32>
    %18 = vector.broadcast %17 : vector<1x10xf32> to vector<2x10xf32>
    %19 = arith.addf %16, %18 : vector<2x10xf32>
    %20 = arith.negf %19 : vector<2x10xf32>
    %21 = math.exp %20 : vector<2x10xf32>
    %cst_17 = arith.constant 1.000000e+00 : f32
    %22 = vector.broadcast %cst_17 : f32 to vector<2x10xf32>
    %23 = arith.addf %22, %21 : vector<2x10xf32>
    %24 = arith.divf %22, %23 : vector<2x10xf32>
    %c0_18 = arith.constant 0 : index
    %c0_19 = arith.constant 0 : index
    %25 = vector.load %arg8[%c0_18, %c0_19] : memref<2x10xf32, #tpu.memory_space<vmem>>, vector<2x10xf32>
    tpu.vector_store %arg8[%c0_18, %c0_19], %24 {strides = array<i32>} : memref<2x10xf32, #tpu.memory_space<vmem>>, vector<2x10xf32>,
    return
  }
  func.func @transform_0(%arg0: i32) -> (i32, i32) {
    %c0_i32 = arith.constant 0 : i32
    %c0_i32_0 = arith.constant 0 : i32
    return %arg0, %c0_i32 : i32, i32
  }
  func.func @transform_1(%arg0: i32) -> (i32, i32) {
    %c0_i32 = arith.constant 0 : i32
    %c0_i32_0 = arith.constant 0 : i32
    %c0_i32_1 = arith.constant 0 : i32
    return %c0_i32, %c0_i32_0 : i32, i32
  }
  func.func @transform_2(%arg0: i32) -> (i32, i32) {
    %c0_i32 = arith.constant 0 : i32
    %c0_i32_0 = arith.constant 0 : i32
    %c0_i32_1 = arith.constant 0 : i32
    return %c0_i32, %c0_i32_0 : i32, i32
  }
  func.func @transform_3(%arg0: i32) -> (i32, i32) {
    %c0_i32 = arith.constant 0 : i32
    %c0_i32_0 = arith.constant 0 : i32
    %c0_i32_1 = arith.constant 0 : i32
    return %c0_i32, %c0_i32_0 : i32, i32
  }
  func.func @transform_4(%arg0: i32) -> (i32, i32) {
    %c0_i32 = arith.constant 0 : i32
    %c0_i32_0 = arith.constant 0 : i32
    %c0_i32_1 = arith.constant 0 : i32
    return %c0_i32, %c0_i32_0 : i32, i32
  }
  func.func @transform_5(%arg0: i32) -> (i32, i32) {
    %c0_i32 = arith.constant 0 : i32
    %c0_i32_0 = arith.constant 0 : i32
    %c0_i32_1 = arith.constant 0 : i32
    return %c0_i32, %c0_i32_0 : i32, i32
  }
  func.func @transform_6(%arg0: i32) -> (i32, i32) {
    %c0_i32 = arith.constant 0 : i32
    %c0_i32_0 = arith.constant 0 : i32
    %c0_i32_1 = arith.constant 0 : i32
    return %c0_i32, %c0_i32_0 : i32, i32
  }
  func.func @transform_7(%arg0: i32) -> (i32, i32) {
    %c0_i32 = arith.constant 0 : i32
    %c0_i32_0 = arith.constant 0 : i32
    return %arg0, %c0_i32 : i32, i32
  }
}

</mosaic_0001>

<bundles_post_ra>
// kernel: mlp2_forward.1
= control target key start
LH: loop header
LB: loop body
LE: loop exit
PB: predicated region body
PF: predicated region fallthrough
CT: control target
= control target key end

     0   :  { %12 = vsyncpa [#allocation3], 0  ;;  %s1201_s0 = inlined_call_operand.vmem [shape: f32[2,784], index: 0, kind: input, shape index: {}]   ;;  %s1202_s1 = inlined_call_operand.hbm [shape: f32[784,256], index: 1, kind: input, shape index: {}]   ;;  %s1203_s2 = inlined_call_operand.vmem [shape: f32[1,256], index: 2, kind: input, shape index: {}]   ;;  %s1204_s3 = inlined_call_operand.vmem [shape: f32[256,128], index: 3, kind: input, shape index: {}]   ;;  %s1205_s4 = inlined_call_operand.vmem [shape: f32[1,128], index: 4, kind: input, shape index: {}]   ;;  %s1206_s5 = inlined_call_operand.vmem [shape: f32[128,10], index: 5, kind: input, shape index: {}]   ;;  %s1207_s6 = inlined_call_operand.vmem [shape: f32[1,10], index: 6, kind: input, shape index: {}]   ;;  %s1208_s7 = inlined_call_operand.hbm [shape: f32[2,10], index: 7, kind: output, shape index: {}]  }
   0x1   :  { %13 = vsyncpa [#allocation4], 0  ;;  %s955_s24 = smov [#allocation2]  }
   0x2   :  { %s21_s25 = sshll.u32 %s955_s24, 4  ;;  %s22_s25 = int_to_ptr.vmem [resolvable:$true] %s21_s25 }
   0x3   :  { %s919_s26 = scalar_lea.vmem %s22_s25, 25088  ;;  %p924_p1 = scmp.lt.s32.totalorder %s22_s25, %s22_s25 }
   0x4   :  { %p920_p0 = scmp.ne.s32.totalorder %s22_s25, %s919_s26  ;;  %p925_p2 = scmp.lt.s32.totalorder %s919_s26, %s919_s26 }
   0x6   :  { %p926_p3 = por %p925_p2, %p924_p1 }
   0x8   :  { %p927_p4 = pnand %p926_p3, %p920_p0 }
   0xa   :  { %930 = shalt.err (!%p927_p4)
}
   0xb   :  { %s956_s27 = smov 256   ;;  %s957_s28 = smov 16  }
   0xc   :  { %27 = dma.hbm_to_vmem [thread:$0]  %s1202_s1, 25088, %s22_s25, [#allocation3], %s956_s27, %s956_s27, %s957_s28  }
   0xd   :  { %951 = dma.done.wait [#allocation3], 25088  }
   0xe   :  { %952 = vsyncadd [#allocation3], 4294942208  ;;  %v74_v0 = vld [vmem:[#allocation2 + $0xf8] sm:$0xff]  ;;  %v73_v1 = vld [vmem:[#allocation2 + $0xf0] sm:$0xff]  ;;  %vm292_vm0 = vcmask 130048   ;;  %vm960_vm1 = vmmov 0  }
   0xf   :  { %v72_v2 = vld [vmem:[#allocation2 + $0xe8] sm:$0xff]  ;;  %295 = vmatprep.subr.mxu0 %v74_v0  ;;  %v138_v3 = vld [vmem:[#allocation2 + $0x2f8] sm:$0xff]  ;;  %v71_v4 = vld [vmem:[#allocation2 + $0xe0] sm:$0xff]  ;;  %vm790_vm2 = vcmask 74752  }
  0x10   :  { %v137_v5 = vld [vmem:[#allocation2 + $0x2f0] sm:$0xff]  ;;  %296 = vmatpush1.msra.mxu0 %v73_v1  ;;  %366 = vmatprep.subr.mxu1 %v138_v3  ;;  %v70_v6 = vld [vmem:[#allocation2 + $0xd8] sm:$0xff]  ;;  %v136_v7 = vld [vmem:[#allocation2 + $0x2e8] sm:$0xff] }
  0x11   :  { %297 = vmatprep.subr.mxu0 %v72_v2  ;;  %367 = vmatpush1.msra.mxu1 %v137_v5  ;;  %v69_v8 = vld [vmem:[#allocation2 + $0xd0] sm:$0xff]  ;;  %v135_v9 = vld [vmem:[#allocation2 + $0x2e0] sm:$0xff]  ;;  %v134_v10 = vld [vmem:[#allocation2 + $0x2d8] sm:$0xff] }
  0x12   :  { %298 = vmatpush1.msra.mxu0 %v71_v4  ;;  %368 = vmatprep.subr.mxu1 %v136_v7  ;;  %v68_v11 = vld [vmem:[#allocation2 + $0xc8] sm:$0xff]  ;;  %v133_v12 = vld [vmem:[#allocation2 + $0x2d0] sm:$0xff]  ;;  %v67_v13 = vld [vmem:[#allocation2 + $0xc0] sm:$0xff] }
  0x13   :  { %299 = vmatprep.subr.mxu0 %v70_v6  ;;  %369 = vmatpush1.msra.mxu1 %v135_v9  ;;  %v132_v14 = vld [vmem:[#allocation2 + $0x2c8] sm:$0xff]  ;;  %v66_v15 = vld [vmem:[#allocation2 + $0xb8] sm:$0xff]  ;;  %v131_v16 = vld [vmem:[#allocation2 + $0x2c0] sm:$0xff] }
  0x14   :  { %300 = vmatpush1.msra.mxu0 %v69_v8  ;;  %370 = vmatprep.subr.mxu1 %v134_v10  ;;  %v65_v17 = vld [vmem:[#allocation2 + $0xb0] sm:$0xff]  ;;  %v130_v18 = vld [vmem:[#allocation2 + $0x2b8] sm:$0xff]  ;;  %v64_v19 = vld [vmem:[#allocation2 + $0xa8] sm:$0xff] }
  0x15   :  { %301 = vmatprep.subr.mxu0 %v68_v11  ;;  %371 = vmatpush1.msra.mxu1 %v133_v12  ;;  %v129_v20 = vld [vmem:[#allocation2 + $0x2b0] sm:$0xff]  ;;  %v63_v21 = vld [vmem:[#allocation2 + $0xa0] sm:$0xff]  ;;  %v128_v22 = vld [vmem:[#allocation2 + $0x2a8] sm:$0xff] }
  0x16   :  { %302 = vmatpush1.msra.mxu0 %v67_v13  ;;  %372 = vmatprep.subr.mxu1 %v132_v14  ;;  %v62_v23 = vld [vmem:[#allocation2 + $0x98] sm:$0xff]  ;;  %v127_v24 = vld [vmem:[#allocation2 + $0x2a0] sm:$0xff]  ;;  %v61_v25 = vld [vmem:[#allocation2 + $0x90] sm:$0xff] }
  0x17   :  { %303 = vmatprep.subr.mxu0 %v66_v15  ;;  %373 = vmatpush1.msra.mxu1 %v131_v16  ;;  %v126_v26 = vld [vmem:[#allocation2 + $0x298] sm:$0xff]  ;;  %v60_v27 = vld [vmem:[#allocation2 + $0x88] sm:$0xff]  ;;  %v125_v28 = vld [vmem:[#allocation2 + $0x290] sm:$0xff] }
  0x18   :  { %304 = vmatpush1.msra.mxu0 %v65_v17  ;;  %374 = vmatprep.subr.mxu1 %v130_v18  ;;  %v59_v29 = vld [vmem:[#allocation2 + $0x80] sm:$0xff]  ;;  %v124_v30 = vld [vmem:[#allocation2 + $0x288] sm:$0xff]  ;;  %v58_v31 = vld [vmem:[#allocation2 + $0x78] sm:$0xff] }
  0x19   :  { %305 = vmatprep.subr.mxu0 %v64_v19  ;;  %375 = vmatpush1.msra.mxu1 %v129_v20  ;;  %v123_v32 = vld [vmem:[#allocation2 + $0x280] sm:$0xff]  ;;  %v57_v33 = vld [vmem:[#allocation2 + $0x70] sm:$0xff]  ;;  %v122_v34 = vld [vmem:[#allocation2 + $0x278] sm:$0xff] }
  0x1a   :  { %306 = vmatpush1.msra.mxu0 %v63_v21  ;;  %376 = vmatprep.subr.mxu1 %v128_v22  ;;  %v56_v35 = vld [vmem:[#allocation2 + $0x68] sm:$0xff]  ;;  %v121_v36 = vld [vmem:[#allocation2 + $0x270] sm:$0xff]  ;;  %v55_v37 = vld [vmem:[#allocation2 + $0x60] sm:$0xff] }
  0x1b   :  { %307 = vmatprep.subr.mxu0 %v62_v23  ;;  %377 = vmatpush1.msra.mxu1 %v127_v24  ;;  %v120_v38 = vld [vmem:[#allocation2 + $0x268] sm:$0xff]  ;;  %v54_v39 = vld [vmem:[#allocation2 + $0x58] sm:$0xff]  ;;  %v119_v40 = vld [vmem:[#allocation2 + $0x260] sm:$0xff] }
  0x1c   :  { %308 = vmatpush1.msra.mxu0 %v61_v25  ;;  %378 = vmatprep.subr.mxu1 %v126_v26  ;;  %v53_v41 = vld [vmem:[#allocation2 + $0x50] sm:$0xff]  ;;  %v118_v42 = vld [vmem:[#allocation2 + $0x258] sm:$0xff]  ;;  %v52_v43 = vld [vmem:[#allocation2 + $0x48] sm:$0xff] }
  0x1d   :  { %309 = vmatprep.subr.mxu0 %v60_v27  ;;  %379 = vmatpush1.msra.mxu1 %v125_v28  ;;  %v117_v44 = vld [vmem:[#allocation2 + $0x250] sm:$0xff]  ;;  %v51_v45 = vld [vmem:[#allocation2 + $0x40] sm:$0xff]  ;;  %v116_v46 = vld [vmem:[#allocation2 + $0x248] sm:$0xff]  ;;  %v241_v27 = vlaneseq  ;;  %v958_v28 = vmov 1983009808  }
  0x1e   :  { %310 = vmatpush1.msra.mxu0 %v59_v29  ;;  %380 = vmatprep.subr.mxu1 %v124_v30  ;;  %v50_v47 = vld [vmem:[#allocation2 + $0x38] sm:$0xff]  ;;  %v115_v48 = vld [vmem:[#allocation2 + $0x240] sm:$0xff]  ;;  %v49_v49 = vld [vmem:[#allocation2 + $0x30] sm:$0xff]  ;;  %v255_v29 = vunpack.c.l.s4 %v958_v28 }
  0x1f   :  { %311 = vmatprep.subr.mxu0 %v58_v31  ;;  %381 = vmatpush1.msra.mxu1 %v123_v32  ;;  %v114_v50 = vld [vmem:[#allocation2 + $0x238] sm:$0xff]  ;;  %v48_v51 = vld [vmem:[#allocation2 + $0x28] sm:$0xff]  ;;  %v113_v52 = vld [vmem:[#allocation2 + $0x230] sm:$0xff] }
  0x20   :  { %312 = vmatpush1.msra.mxu0 %v57_v33  ;;  %382 = vmatprep.subr.mxu1 %v122_v34  ;;  %v47_v53 = vld [vmem:[#allocation2 + $0x20] sm:$0xff]  ;;  %v112_v54 = vld [vmem:[#allocation2 + $0x228] sm:$0xff]  ;;  %v46_v55 = vld [vmem:[#allocation2 + $0x18] sm:$0xff] }
  0x21   :  { %313 = vmatprep.subr.mxu0 %v56_v35  ;;  %383 = vmatpush1.msra.mxu1 %v121_v36  ;;  %v111_v56 = vld [vmem:[#allocation2 + $0x220] sm:$0xff]  ;;  %v45_v57 = vld [vmem:[#allocation2 + $0x10] sm:$0xff]  ;;  %v110_v58 = vld [vmem:[#allocation2 + $0x218] sm:$0xff] }
  0x22   :  { %314 = vmatpush1.msra.mxu0 %v55_v37  ;;  %384 = vmatprep.subr.mxu1 %v120_v38  ;;  %v44_v59 = vld [vmem:[#allocation2 + $0x8] sm:$0xff]  ;;  %v109_v60 = vld [vmem:[#allocation2 + $0x210] sm:$0xff]  ;;  %v43_v61 = vld [vmem:[#allocation2] sm:$0xff]  ;;  %v1005_v38 = vshrl.u32 %v241_v27, 7 }
  0x23   :  { %315 = vmatprep.subr.mxu0 %v54_v39  ;;  %385 = vmatpush1.msra.mxu1 %v119_v40  ;;  %v108_v62 = vld [vmem:[#allocation2 + $0x208] sm:$0xff]  ;;  %v106_v63 = vld [vmem:[#allocation2 + $0x1f8] sm:$0xff]  ;;  %v107_v0 = vld [vmem:[#allocation2 + $0x200] sm:$0xff]  ;;  %v256_v39 = vunpack.c.0.s8 %v255_v29 }
  0x24   :  { %316 = vmatpush1.msra.mxu0 %v53_v41  ;;  %386 = vmatprep.subr.mxu1 %v118_v42  ;;  %v105_v1 = vld [vmem:[#allocation2 + $0x1f0] sm:$0xff]  ;;  %v170_v2 = vld [vmem:[#allocation2 + $0x3f8] sm:$0xff]  ;;  %v104_v3 = vld [vmem:[#allocation2 + $0x1e8] sm:$0xff] }
  0x25   :  { %317 = vmatprep.subr.mxu0 %v52_v43  ;;  %387 = vmatpush1.msra.mxu1 %v117_v44  ;;  %v169_v4 = vld [vmem:[#allocation2 + $0x3f0] sm:$0xff]  ;;  %v103_v5 = vld [vmem:[#allocation2 + $0x1e0] sm:$0xff]  ;;  %v168_v6 = vld [vmem:[#allocation2 + $0x3e8] sm:$0xff] }
  0x26   :  { %318 = vmatpush1.msra.mxu0 %v51_v45  ;;  %388 = vmatprep.subr.mxu1 %v116_v46  ;;  %v102_v7 = vld [vmem:[#allocation2 + $0x1d8] sm:$0xff]  ;;  %v167_v8 = vld [vmem:[#allocation2 + $0x3e0] sm:$0xff]  ;;  %v101_v9 = vld [vmem:[#allocation2 + $0x1d0] sm:$0xff] }
  0x27   :  { %319 = vmatprep.subr.mxu0 %v50_v47  ;;  %389 = vmatpush1.msra.mxu1 %v115_v48  ;;  %v166_v10 = vld [vmem:[#allocation2 + $0x3d8] sm:$0xff]  ;;  %v100_v11 = vld [vmem:[#allocation2 + $0x1c8] sm:$0xff]  ;;  %v165_v12 = vld [vmem:[#allocation2 + $0x3d0] sm:$0xff]  ;;  %v1008_v48 = vsub.s32 %v256_v39, %v1005_v38 }
  0x28   :  { %320 = vmatpush1.msra.mxu0 %v49_v49  ;;  %390 = vmatprep.subr.mxu1 %v114_v50  ;;  %v99_v13 = vld [vmem:[#allocation2 + $0x1c0] sm:$0xff]  ;;  %v164_v14 = vld [vmem:[#allocation2 + $0x3c8] sm:$0xff]  ;;  %v98_v15 = vld [vmem:[#allocation2 + $0x1b8] sm:$0xff] }
  0x29   :  { %321 = vmatprep.subr.mxu0 %v48_v51  ;;  %391 = vmatpush1.msra.mxu1 %v113_v52  ;;  %v163_v16 = vld [vmem:[#allocation2 + $0x3c0] sm:$0xff]  ;;  %v97_v17 = vld [vmem:[#allocation2 + $0x1b0] sm:$0xff]  ;;  %v162_v18 = vld [vmem:[#allocation2 + $0x3b8] sm:$0xff] }
  0x2a   :  { %322 = vmatpush1.msra.mxu0 %v47_v53  ;;  %392 = vmatprep.subr.mxu1 %v112_v54  ;;  %v96_v19 = vld [vmem:[#allocation2 + $0x1a8] sm:$0xff]  ;;  %v161_v20 = vld [vmem:[#allocation2 + $0x3b0] sm:$0xff]  ;;  %v95_v21 = vld [vmem:[#allocation2 + $0x1a0] sm:$0xff] }
  0x2b   :  { %323 = vmatprep.subr.mxu0 %v46_v55  ;;  %393 = vmatpush1.msra.mxu1 %v111_v56  ;;  %v160_v22 = vld [vmem:[#allocation2 + $0x3a8] sm:$0xff]  ;;  %v94_v23 = vld [vmem:[#allocation2 + $0x198] sm:$0xff]  ;;  %v159_v24 = vld [vmem:[#allocation2 + $0x3a0] sm:$0xff] }
  0x2c   :  { %324 = vmatpush1.msra.mxu0 %v45_v57  ;;  %394 = vmatprep.subr.mxu1 %v110_v58  ;;  %v93_v25 = vld [vmem:[#allocation2 + $0x190] sm:$0xff]  ;;  %v158_v26 = vld [vmem:[#allocation2 + $0x398] sm:$0xff]  ;;  %v92_v30 = vld [vmem:[#allocation2 + $0x188] sm:$0xff] }
  0x2d   :  { %325 = vmatprep.subr.mxu0 %v44_v59  ;;  %395 = vmatpush1.msra.mxu1 %v109_v60  ;;  %v157_v31 = vld [vmem:[#allocation2 + $0x390] sm:$0xff]  ;;  %v91_v32 = vld [vmem:[#allocation2 + $0x180] sm:$0xff]  ;;  %v156_v33 = vld [vmem:[#allocation2 + $0x388] sm:$0xff] }
  0x2e   :  { %326 = vmatpush1.msra.mxu0 %v43_v61  ;;  %396 = vmatprep.subr.mxu1 %v108_v62  ;;  %v90_v34 = vld [vmem:[#allocation2 + $0x178] sm:$0xff]  ;;  %v155_v35 = vld [vmem:[#allocation2 + $0x380] sm:$0xff]  ;;  %v89_v36 = vld [vmem:[#allocation2 + $0x170] sm:$0xff] }
  0x2f   :  { %327 = vmatprep.subr.mxu0 %v106_v63  ;;  %397 = vmatpush1.msra.mxu1 %v107_v0  ;;  %v154_v37 = vld [vmem:[#allocation2 + $0x378] sm:$0xff]  ;;  %v88_v40 = vld [vmem:[#allocation2 + $0x168] sm:$0xff]  ;;  %v153_v41 = vld [vmem:[#allocation2 + $0x370] sm:$0xff] }
  0x30   :  { %328 = vmatpush2.msra.mxu0 %v105_v1  ;;  %398 = vmatprep.subr.mxu1 %v170_v2  ;;  %v87_v42 = vld [vmem:[#allocation2 + $0x160] sm:$0xff]  ;;  %v152_v43 = vld [vmem:[#allocation2 + $0x368] sm:$0xff]  ;;  %v86_v44 = vld [vmem:[#allocation2 + $0x158] sm:$0xff] }
  0x31   :  { %329 = vmatprep.subr.mxu0 %v104_v3  ;;  %399 = vmatpush2.msra.mxu1 %v169_v4  ;;  %v151_v45 = vld [vmem:[#allocation2 + $0x360] sm:$0xff]  ;;  %v85_v46 = vld [vmem:[#allocation2 + $0x150] sm:$0xff]  ;;  %v150_v47 = vld [vmem:[#allocation2 + $0x358] sm:$0xff] }
  0x32   :  { %330 = vmatpush2.msra.mxu0 %v103_v5  ;;  %400 = vmatprep.subr.mxu1 %v168_v6  ;;  %v84_v49 = vld [vmem:[#allocation2 + $0x148] sm:$0xff]  ;;  %v149_v50 = vld [vmem:[#allocation2 + $0x350] sm:$0xff]  ;;  %v41_v51 = vld [vmem:[%s1201_s0] sm:$0xff] }
  0x33   :  { %331 = vmatprep.subr.mxu0 %v102_v7  ;;  %401 = vmatpush2.msra.mxu1 %v167_v8  ;;  %v83_v52 = vld [vmem:[#allocation2 + $0x140] sm:$0xff]  ;;  %v148_v53 = vld [vmem:[#allocation2 + $0x348] sm:$0xff]  ;;  %v82_v54 = vld [vmem:[#allocation2 + $0x138] sm:$0xff]  ;;  %v260_v58 = vrot.slane %v41_v51, %v1008_v48  ;;  %v253_v59 = vcombine.high %v41_v51, %v41_v51 }
  0x34   :  { %332 = vmatpush2.msra.mxu0 %v101_v9  ;;  %402 = vmatprep.subr.mxu1 %v166_v10  ;;  %v147_v55 = vld [vmem:[#allocation2 + $0x340] sm:$0xff]  ;;  %v81_v56 = vld [vmem:[#allocation2 + $0x130] sm:$0xff]  ;;  %v146_v57 = vld [vmem:[#allocation2 + $0x338] sm:$0xff] }
  0x35   :  { %333 = vmatprep.subr.mxu0 %v100_v11  ;;  %403 = vmatpush2.msra.mxu1 %v165_v12  ;;  %v80_v60 = vld [vmem:[#allocation2 + $0x128] sm:$0xff]  ;;  %v145_v61 = vld [vmem:[#allocation2 + $0x330] sm:$0xff]  ;;  %v79_v62 = vld [vmem:[#allocation2 + $0x120] sm:$0xff]  ;;  %v268_v4 = vcombine.high %v260_v58, %v260_v58  ;;  %v267_v5 = vrot.slane %v253_v59, %v1008_v48 }
  0x36   :  { %334 = vmatpush2.msra.mxu0 %v99_v13  ;;  %404 = vmatprep.subr.mxu1 %v164_v14  ;;  %v144_v63 = vld [vmem:[#allocation2 + $0x328] sm:$0xff]  ;;  %v78_v0 = vld [vmem:[#allocation2 + $0x118] sm:$0xff]  ;;  %v143_v1 = vld [vmem:[#allocation2 + $0x320] sm:$0xff] }
  0x37   :  { %335 = vmatprep.subr.mxu0 %v98_v15  ;;  %405 = vmatpush2.msra.mxu1 %v163_v16  ;;  %v77_v2 = vld [vmem:[#allocation2 + $0x110] sm:$0xff]  ;;  %v142_v3 = vld [vmem:[#allocation2 + $0x318] sm:$0xff]  ;;  %v76_v6 = vld [vmem:[#allocation2 + $0x108] sm:$0xff]  ;;  %v269_v12 = vcombine.high %v267_v5, %v267_v5 }
  0x38   :  { %336 = vmatpush2.msra.mxu0 %v97_v17  ;;  %406 = vmatprep.subr.mxu1 %v162_v18  ;;  %v75_v7 = vld [vmem:[#allocation2 + $0x100] sm:$0xff]  ;;  %v141_v8 = vld [vmem:[#allocation2 + $0x310] sm:$0xff]  ;;  %v140_v9 = vld [vmem:[#allocation2 + $0x308] sm:$0xff] }
  0x39   :  { %337 = vmatprep.subr.mxu0 %v96_v19  ;;  %407 = vmatpush2.msra.mxu1 %v161_v20  ;;  %v202_v10 = vld [vmem:[#allocation2 + $0x4f8] sm:$0xff]  ;;  %v139_v11 = vld [vmem:[#allocation2 + $0x300] sm:$0xff]  ;;  %v201_v13 = vld [vmem:[#allocation2 + $0x4f0] sm:$0xff] }
  0x3a   :  { %338 = vmatpush2.msra.mxu0 %v95_v21  ;;  %408 = vmatprep.subr.mxu1 %v160_v22  ;;  %v200_v14 = vld [vmem:[#allocation2 + $0x4e8] sm:$0xff]  ;;  %v199_v16 = vld [vmem:[#allocation2 + $0x4e0] sm:$0xff]  ;;  %v238_v17 = vld [vmem:[#allocation2 + $0x618] sm:$0xff] }
  0x3b   :  { %339 = vmatprep.subr.mxu0 %v94_v23  ;;  %409 = vmatpush2.msra.mxu1 %v159_v24  ;;  %v42_v15 = vld [vmem:[%s1201_s0 + $0x8] sm:$0x3f]  ;;  %v198_v19 = vld [vmem:[#allocation2 + $0x4d8] sm:$0xff]  ;;  %v237_v20 = vld [vmem:[#allocation2 + $0x610] sm:$0xff] }
  0x3c   :  { %340 = vmatpush2.msra.mxu0 %v93_v25  ;;  %410 = vmatprep.subr.mxu1 %v158_v26  ;;  %v1019_v18 = vrot.slane %v42_v15, %v1008_v48  ;;  %v270_v21 = vcombine.high %v42_v15, %v42_v15  ;;  %v197_v22 = vld [vmem:[#allocation2 + $0x4d0] sm:$0xff]  ;;  %v236_v23 = vld [vmem:[#allocation2 + $0x608] sm:$0xff]  ;;  %v195_v26 = vld [vmem:[#allocation2 + $0x4c0] sm:$0xff] }
  0x3d   :  { %341 = vmatprep.subr.mxu0 %v92_v30  ;;  %411 = vmatpush2.msra.mxu1 %v157_v31  ;;  %v196_v25 = vld [vmem:[#allocation2 + $0x4c8] sm:$0xff]  ;;  %v235_v27 = vld [vmem:[#allocation2 + $0x600] sm:$0xff]  ;;  %v194_v28 = vld [vmem:[#allocation2 + $0x4b8] sm:$0xff] }
  0x3e   :  { %342 = vmatpush2.msra.mxu0 %v91_v32  ;;  %412 = vmatprep.subr.mxu1 %v156_v33  ;;  %v285_v24 = vcombine.high %v1019_v18, %v1019_v18  ;;  %v284_v29 = vrot.slane %v270_v21, %v1008_v48  ;;  %v193_v30 = vld [vmem:[#allocation2 + $0x4b0] sm:$0xff]  ;;  %v192_v31 = vld [vmem:[#allocation2 + $0x4a8] sm:$0xff]  ;;  %v191_v32 = vld [vmem:[#allocation2 + $0x4a0] sm:$0xff]  ;;  %v959_v33 = vmov 0.0  }
  0x3f   :  { %343 = vmatprep.subr.mxu0 %v90_v34  ;;  %413 = vmatpush2.msra.mxu1 %v155_v35  ;;  %v190_v34 = vld [vmem:[#allocation2 + $0x498] sm:$0xff]  ;;  %v189_v35 = vld [vmem:[#allocation2 + $0x490] sm:$0xff] }
  0x40   :  { %344 = vmatpush2.msra.mxu0 %v89_v36  ;;  %414 = vmatprep.subr.mxu1 %v154_v37  ;;  %v188_v36 = vld [vmem:[#allocation2 + $0x488] sm:$0xff]  ;;  %v187_v37 = vld [vmem:[#allocation2 + $0x480] sm:$0xff]  ;;  %v186_v39 = vld [vmem:[#allocation2 + $0x478] sm:$0xff] }
  0x41   :  { %345 = vmatprep.subr.mxu0 %v88_v40  ;;  %415 = vmatpush2.msra.mxu1 %v153_v41  ;;  %v185_v40 = vld [vmem:[#allocation2 + $0x470] sm:$0xff]  ;;  %v184_v41 = vld [vmem:[#allocation2 + $0x468] sm:$0xff]  ;;  %v174_v51 = vld [vmem:[#allocation2 + $0x418] sm:$0xff] }
  0x42   :  { %346 = vmatpush2.msra.mxu0 %v87_v42  ;;  %416 = vmatprep.subr.mxu1 %v152_v43  ;;  %v183_v42 = vld [vmem:[#allocation2 + $0x460] sm:$0xff]  ;;  %v182_v43 = vld [vmem:[#allocation2 + $0x458] sm:$0xff]  ;;  %v177_v48 = vld [vmem:[#allocation2 + $0x430] sm:$0xff] }
  0x43   :  { %347 = vmatprep.subr.mxu0 %v86_v44  ;;  %417 = vmatpush2.msra.mxu1 %v151_v45  ;;  %v181_v44 = vld [vmem:[#allocation2 + $0x450] sm:$0xff]  ;;  %v180_v45 = vld [vmem:[#allocation2 + $0x448] sm:$0xff]  ;;  %v230_v59 = vld [vmem:[#allocation2 + $0x5d8] sm:$0xff] }
  0x44   :  { %348 = vmatpush2.msra.mxu0 %v85_v46  ;;  %418 = vmatprep.subr.mxu1 %v150_v47  ;;  %v179_v46 = vld [vmem:[#allocation2 + $0x440] sm:$0xff]  ;;  %v178_v47 = vld [vmem:[#allocation2 + $0x438] sm:$0xff]  ;;  %v205_v21 = vld [vmem:[#allocation2 + $0x510] sm:$0xff] }
  0x45   :  { %349 = vmatprep.subr.mxu0 %v84_v49  ;;  %419 = vmatpush2.msra.mxu1 %v149_v50  ;;  %v176_v49 = vld [vmem:[#allocation2 + $0x428] sm:$0xff]  ;;  %v175_v50 = vld [vmem:[#allocation2 + $0x420] sm:$0xff]  ;;  %v210_v15 = vld [vmem:[#allocation2 + $0x538] sm:$0xff] }
  0x46   :  { %350 = vmatpush2.msra.mxu0 %v83_v52  ;;  %420 = vmatprep.subr.mxu1 %v148_v53  ;;  %v173_v52 = vld [vmem:[#allocation2 + $0x410] sm:$0xff]  ;;  %v172_v53 = vld [vmem:[#allocation2 + $0x408] sm:$0xff] }
  0x47   :  { %351 = vmatprep.subr.mxu0 %v82_v54  ;;  %421 = vmatpush2.msra.mxu1 %v147_v55  ;;  %v171_v54 = vld [vmem:[#allocation2 + $0x400] sm:$0xff]  ;;  %v234_v55 = vld [vmem:[#allocation2 + $0x5f8] sm:$0xff] }
  0x48   :  { %352 = vmatpush2.msra.mxu0 %v81_v56  ;;  %422 = vmatprep.subr.mxu1 %v146_v57  ;;  %v233_v56 = vld [vmem:[#allocation2 + $0x5f0] sm:$0xff]  ;;  %v232_v57 = vld [vmem:[#allocation2 + $0x5e8] sm:$0xff] }
  0x49   :  { %353 = vmatprep.subr.mxu0 %v80_v60  ;;  %423 = vmatpush2.msra.mxu1 %v145_v61  ;;  %v229_v60 = vld [vmem:[#allocation2 + $0x5d0] sm:$0xff]  ;;  %v228_v61 = vld [vmem:[#allocation2 + $0x5c8] sm:$0xff] }
  0x4a   :  { %354 = vmatpush2.msra.mxu0 %v79_v62  ;;  %424 = vmatprep.subr.mxu1 %v144_v63  ;;  %v227_v62 = vld [vmem:[#allocation2 + $0x5c0] sm:$0xff]  ;;  %v226_v63 = vld [vmem:[#allocation2 + $0x5b8] sm:$0xff] }
  0x4b   :  { %355 = vmatprep.subr.mxu0 %v78_v0  ;;  %425 = vmatpush2.msra.mxu1 %v143_v1  ;;  %v225_v0 = vld [vmem:[#allocation2 + $0x5b0] sm:$0xff]  ;;  %v224_v1 = vld [vmem:[#allocation2 + $0x5a8] sm:$0xff] }
  0x4c   :  { %356 = vmatpush2.msra.mxu0 %v77_v2  ;;  %426 = vmatprep.subr.mxu1 %v142_v3  ;;  %v223_v2 = vld [vmem:[#allocation2 + $0x5a0] sm:$0xff]  ;;  %v222_v3 = vld [vmem:[#allocation2 + $0x598] sm:$0xff] }
  0x4d   :  { %357 = vmatprep.subr.mxu0 %v76_v6  ;;  %359 = vmatprep.mubr.f32.mxu0 %v268_v4  ;;  %v221_v4 = vld [vmem:[#allocation2 + $0x590] sm:$0xff]  ;;  %v219_v6 = vld [vmem:[#allocation2 + $0x580] sm:$0xff] }
  0x4e   :  { %358 = vmatpush2.msra.mxu0 %v75_v7  ;;  %427 = vmatpush2.msra.mxu1 %v141_v8  ;;  %v218_v7 = vld [vmem:[#allocation2 + $0x578] sm:$0xff]  ;;  %v217_v8 = vld [vmem:[#allocation2 + $0x570] sm:$0xff] }
  0x4f   :  { %360 = vmatmul.mubr.f32.vlgmr.msra.gmra.mxu0 %v260_v58  ;;  %428 = vmatprep.subr.mxu1 %v140_v9  ;;  %v231_v58 = vld [vmem:[#allocation2 + $0x5e0] sm:$0xff]  ;;  %v216_v9 = vld [vmem:[#allocation2 + $0x568] sm:$0xff] }
  0x50   :  { %437 = vmatprep.subr.mxu0 %v202_v10  ;;  %429 = vmatpush2.msra.mxu1 %v139_v11  ;;  %v215_v10 = vld [vmem:[#allocation2 + $0x560] sm:$0xff]  ;;  %v214_v11 = vld [vmem:[#allocation2 + $0x558] sm:$0xff] }
  0x51   :  { %430 = vmatprep.mubr.f32.mxu1 %v269_v12  ;;  %438 = vmatpush1.msra.mxu0 %v201_v13  ;;  %v213_v12 = vld [vmem:[#allocation2 + $0x550] sm:$0xff]  ;;  %v212_v13 = vld [vmem:[#allocation2 + $0x548] sm:$0xff] }
  0x52   :  { %431 = vmatmul.mubr.f32.vlgmr.msra.gmra.mxu1 %v267_v5  ;;  %439 = vmatprep.subr.mxu0 %v200_v14  ;;  %v220_v5 = vld [vmem:[#allocation2 + $0x588] sm:$0xff]  ;;  %v211_v14 = vld [vmem:[#allocation2 + $0x540] sm:$0xff] }
  0x53   :  { %440 = vmatpush1.msra.mxu0 %v199_v16  ;;  %536 = vmatprep.subr.mxu1 %v238_v17  ;;  %v209_v16 = vld [vmem:[#allocation2 + $0x530] sm:$0xff]  ;;  %v208_v17 = vld [vmem:[#allocation2 + $0x528] sm:$0xff] }
  0x54   :  { %441 = vmatprep.subr.mxu0 %v198_v19  ;;  %537 = vmatpush1.msra.mxu1 %v237_v20  ;;  %v207_v19 = vld [vmem:[#allocation2 + $0x520] sm:$0xff]  ;;  %v206_v20 = vld [vmem:[#allocation2 + $0x518] sm:$0xff] }
  0x55   :  { %442 = vmatpush1.msra.mxu0 %v197_v22  ;;  %538 = vmatprep.subr.mxu1 %v236_v23  ;;  %v204_v22 = vld [vmem:[#allocation2 + $0x508] sm:$0xff]  ;;  %v203_v23 = vld [vmem:[#allocation2 + $0x500] sm:$0xff] }
  0x56   :  { %443 = vmatprep.subr.mxu0 %v196_v25  ;;  %501 = vmatprep.mubr.f32.mxu0 %v285_v24  ;;  %v612_v24 = vld [vmem:[%s1204_s3 + $0xf8] sm:$0xff] }
  0x57   :  { %444 = vmatpush1.msra.mxu0 %v195_v26  ;;  %539 = vmatpush1.msra.mxu1 %v235_v27  ;;  %v596_v25 = vld [vmem:[%s1204_s3 + $0x78] sm:$0xff]  ;;  %v611_v26 = vld [vmem:[%s1204_s3 + $0xf0] sm:$0xff] }
  0x58   :  { %445 = vmatprep.subr.mxu0 %v194_v28  ;;  %572 = vmatprep.mubr.f32.mxu1 %v959_v33  ;;  %v595_v27 = vld [vmem:[%s1204_s3 + $0x70] sm:$0xff]  ;;  %v594_v28 = vld [vmem:[%s1204_s3 + $0x68] sm:$0xff] }
  0x59   :  { %446 = vmatpush1.msra.mxu0 %v193_v30  ;;  %807 = vmatmul.mubr.msk.f32.vlgmr.msra.gmra.mxu1 %vm292_vm0, %v284_v29  ;;  %v609_v29 = vld [vmem:[%s1204_s3 + $0xe0] sm:$0xff] }
  0x5a   :  { %447 = vmatprep.subr.mxu0 %v192_v31  ;;  %811 = vmatprep.subr.mxu1 %v612_v24  ;;  %v593_v30 = vld [vmem:[%s1204_s3 + $0x60] sm:$0xff]  ;;  %v608_v31 = vld [vmem:[%s1204_s3 + $0xd8] sm:$0xff] }
  0x5b   :  { %448 = vmatpush1.msra.mxu0 %v191_v32  ;;  %812 = vmatpush3.msra.mxu1 %v596_v25  ;;  %v592_v32 = vld [vmem:[%s1204_s3 + $0x58] sm:$0xff]  ;;  %v697_v25 = vld [vmem:[%s1206_s5 + $0x30] sm:$0xff] }
  0x5c   :  { %449 = vmatprep.subr.mxu0 %v190_v34  ;;  %813 = vmatprep.subr.mxu1 %v611_v26  ;;  %v607_v34 = vld [vmem:[%s1204_s3 + $0xd0] sm:$0xff]  ;;  %v698_v24 = vld [vmem:[%s1206_s5 + $0x38] sm:$0xff]  ;;  %v696_v26 = vld [vmem:[%s1206_s5 + $0x28] sm:$0xff] }
  0x5d   :  { %450 = vmatpush1.msra.mxu0 %v189_v35  ;;  %814 = vmatpush3.msra.mxu1 %v595_v27  ;;  %v591_v35 = vld [vmem:[%s1204_s3 + $0x50] sm:$0xff]  ;;  %v695_v27 = vld [vmem:[%s1206_s5 + $0x20] sm:$0xff] }
  0x5e   :  { %451 = vmatprep.subr.mxu0 %v188_v36  ;;  %v606_v36 = vld [vmem:[%s1204_s3 + $0xc8] sm:$0xff] }
  0x5f   :  { %452 = vmatpush1.msra.mxu0 %v187_v37  ;;  %v590_v37 = vld [vmem:[%s1204_s3 + $0x48] sm:$0xff] }
  0x60   :  { %453 = vmatprep.subr.mxu0 %v186_v39  ;;  %v605_v39 = vld [vmem:[%s1204_s3 + $0xc0] sm:$0xff] }
  0x61   :  { %454 = vmatpush1.msra.mxu0 %v185_v40  ;;  %v589_v40 = vld [vmem:[%s1204_s3 + $0x40] sm:$0xff] }
  0x62   :  { %455 = vmatprep.subr.mxu0 %v184_v41  ;;  %v604_v41 = vld [vmem:[%s1204_s3 + $0xb8] sm:$0xff] }
  0x63   :  { %456 = vmatpush1.msra.mxu0 %v183_v42  ;;  %v588_v42 = vld [vmem:[%s1204_s3 + $0x38] sm:$0xff] }
  0x64   :  { %457 = vmatprep.subr.mxu0 %v182_v43  ;;  %v603_v43 = vld [vmem:[%s1204_s3 + $0xb0] sm:$0xff] }
  0x65   :  { %458 = vmatpush1.msra.mxu0 %v181_v44  ;;  %v587_v44 = vld [vmem:[%s1204_s3 + $0x30] sm:$0xff] }
  0x66   :  { %459 = vmatprep.subr.mxu0 %v180_v45  ;;  %v602_v45 = vld [vmem:[%s1204_s3 + $0xa8] sm:$0xff] }
  0x67   :  { %460 = vmatpush1.msra.mxu0 %v179_v46  ;;  %v586_v46 = vld [vmem:[%s1204_s3 + $0x28] sm:$0xff] }
  0x68   :  { %461 = vmatprep.subr.mxu0 %v178_v47  ;;  %v601_v47 = vld [vmem:[%s1204_s3 + $0xa0] sm:$0xff] }
  0x69   :  { %462 = vmatpush1.msra.mxu0 %v177_v48  ;;  %v585_v48 = vld [vmem:[%s1204_s3 + $0x20] sm:$0xff] }
  0x6a   :  { %463 = vmatprep.subr.mxu0 %v176_v49  ;;  %v600_v49 = vld [vmem:[%s1204_s3 + $0x98] sm:$0xff] }
  0x6b   :  { %464 = vmatpush1.msra.mxu0 %v175_v50  ;;  %v584_v50 = vld [vmem:[%s1204_s3 + $0x18] sm:$0xff] }
  0x6c   :  { %465 = vmatprep.subr.mxu0 %v174_v51  ;;  %v599_v51 = vld [vmem:[%s1204_s3 + $0x90] sm:$0xff] }
  0x6d   :  { %466 = vmatpush1.msra.mxu0 %v173_v52  ;;  %v583_v52 = vld [vmem:[%s1204_s3 + $0x10] sm:$0xff] }
  0x6e   :  { %467 = vmatprep.subr.mxu0 %v172_v53  ;;  %v598_v53 = vld [vmem:[%s1204_s3 + $0x88] sm:$0xff] }
  0x6f   :  { %468 = vmatpush1.msra.mxu0 %v171_v54  ;;  %v582_v54 = vld [vmem:[%s1204_s3 + $0x8] sm:$0xff] }
  0x70   :  { %469 = vmatprep.subr.mxu0 %v234_v55  ;;  %v597_v55 = vld [vmem:[%s1204_s3 + $0x80] sm:$0xff] }
  0x71   :  { %470 = vmatpush2.msra.mxu0 %v233_v56  ;;  %v581_v56 = vld [vmem:[%s1204_s3] sm:$0xff] }
  0x72   :  { %471 = vmatprep.subr.mxu0 %v232_v57  ;;  %v243_v57 = vsub.s32 0, %v1005_v38 }
  0x73   :  { %472 = vmatpush2.msra.mxu0 %v231_v58  ;;  %v239_v58 = vld [vmem:[%s1203_s2] sm:$0x3] }
  0x74   :  { %473 = vmatprep.subr.mxu0 %v230_v59  ;;  %v247_v59 = vsub.s32 1, %v1005_v38 }
  0x75   :  { %474 = vmatpush2.msra.mxu0 %v229_v60 }
  0x76   :  { %475 = vmatprep.subr.mxu0 %v228_v61  ;;  %v244_v61 = vrot.slane %v239_v58, %v243_v57 }
  0x77   :  { %476 = vmatpush2.msra.mxu0 %v227_v62  ;;  %v248_v62 = vrot.slane %v239_v58, %v247_v59 }
  0x78   :  { %477 = vmatprep.subr.mxu0 %v226_v63 }
  0x79   :  { %478 = vmatpush2.msra.mxu0 %v225_v0 }
  0x7a   :  { %479 = vmatprep.subr.mxu0 %v224_v1 }
  0x7b   :  { %480 = vmatpush2.msra.mxu0 %v223_v2 }
  0x7c   :  { %481 = vmatprep.subr.mxu0 %v222_v3 }
  0x7d   :  { %482 = vmatpush2.msra.mxu0 %v221_v4 }
  0x7e   :  { %483 = vmatprep.subr.mxu0 %v220_v5 }
  0x7f   :  { %484 = vmatpush2.msra.mxu0 %v219_v6 }
  0x80   :  { %485 = vmatprep.subr.mxu0 %v218_v7 }
  0x81   :  { %486 = vmatpush2.msra.mxu0 %v217_v8 }
  0x82   :  { %487 = vmatprep.subr.mxu0 %v216_v9 }
  0x83   :  { %488 = vmatpush2.msra.mxu0 %v215_v10 }
  0x84   :  { %489 = vmatprep.subr.mxu0 %v214_v11 }
  0x85   :  { %490 = vmatpush2.msra.mxu0 %v213_v12 }
  0x86   :  { %491 = vmatprep.subr.mxu0 %v212_v13 }
  0x87   :  { %492 = vmatpush2.msra.mxu0 %v211_v14 }
  0x88   :  { %493 = vmatprep.subr.mxu0 %v210_v15  ;;  %v706_v15 = vld [vmem:[%s1206_s5 + $0x78] sm:$0xff] }
  0x89   :  { %494 = vmatpush2.msra.mxu0 %v209_v16  ;;  %v705_v16 = vld [vmem:[%s1206_s5 + $0x70] sm:$0xff] }
  0x8a   :  { %495 = vmatprep.subr.mxu0 %v208_v17  ;;  %v704_v17 = vld [vmem:[%s1206_s5 + $0x68] sm:$0xff] }
  0x8b   :  { %496 = vmatpush2.msra.mxu0 %v207_v19  ;;  %v703_v19 = vld [vmem:[%s1206_s5 + $0x60] sm:$0xff] }
  0x8c   :  { %497 = vmatprep.subr.mxu0 %v206_v20  ;;  %v702_v20 = vld [vmem:[%s1206_s5 + $0x58] sm:$0xff] }
  0x8d   :  { %498 = vmatpush2.msra.mxu0 %v205_v21  ;;  %v701_v21 = vld [vmem:[%s1206_s5 + $0x50] sm:$0xff] }
  0x8e   :  { %499 = vmatprep.subr.mxu0 %v204_v22  ;;  %v700_v22 = vld [vmem:[%s1206_s5 + $0x48] sm:$0xff] }
  0x8f   :  { %500 = vmatpush2.msra.mxu0 %v203_v23  ;;  %v699_v23 = vld [vmem:[%s1206_s5 + $0x40] sm:$0xff] }
  0x90   :  { %502 = vmatmul.mubr.f32.vlgmr.msra.gmra.mxu0 %v1019_v18  ;;  %v610_v18 = vld [vmem:[%s1204_s3 + $0xe8] sm:$0xff] }
  0x91   :  { %815 = vmatprep.subr.mxu1 %v610_v18  ;;  %v694_v18 = vld [vmem:[%s1206_s5 + $0x18] sm:$0xff] }
  0x92   :  { %816 = vmatpush3.msra.mxu1 %v594_v28  ;;  %v693_v28 = vld [vmem:[%s1206_s5 + $0x10] sm:$0xff] }
  0x93   :  { %817 = vmatprep.subr.mxu1 %v609_v29  ;;  %v692_v29 = vld [vmem:[%s1206_s5 + $0x8] sm:$0xff] }
  0x94   :  { %818 = vmatpush3.msra.mxu1 %v593_v30  ;;  %v691_v30 = vld [vmem:[%s1206_s5] sm:$0xff]  ;;  %s961_s5 = smov [#allocation5]  }
  0x95   :  { %819 = vmatprep.subr.mxu1 %v608_v31  ;;  %s798_s9 = sshll.u32 %s961_s5, 4  ;;  %s799_s9 = int_to_ptr.vmem [resolvable:$true] %s798_s9 }
  0x96   :  { %820 = vmatpush3.msra.mxu1 %v592_v32  ;;  %v808_v32 = vld [vmem:[%s1205_s4] ss:$0 sm:$0xff]  ;;  %s931_s4 = scalar_lea.vmem %s799_s9, 32  ;;  %p936_p6 = scmp.lt.s32.totalorder %s799_s9, %s799_s9 }
  0x97   :  { %821 = vmatprep.subr.mxu1 %v607_v34  ;;  %p932_p5 = scmp.ne.s32.totalorder %s799_s9, %s931_s4  ;;  %p937_p7 = scmp.lt.s32.totalorder %s931_s4, %s931_s4 }
  0x98   :  { %822 = vmatpush3.msra.mxu1 %v591_v35 }
  0x99   :  { %823 = vmatprep.subr.mxu1 %v606_v36  ;;  %p938_p8 = por %p937_p7, %p936_p6 }
  0x9a   :  { %824 = vmatpush3.msra.mxu1 %v590_v37 }
  0x9b   :  { %825 = vmatprep.subr.mxu1 %v605_v39  ;;  %v809_v39 = vld [vmem:[%s1207_s6] ss:$0 sm:$0xff]  ;;  %p939_p9 = pnand %p938_p8, %p932_p5 }
  0x9c   :  { %826 = vmatpush3.msra.mxu1 %v589_v40 }
  0x9d   :  { %827 = vmatprep.subr.mxu1 %v604_v41 }
  0x9e   :  { %828 = vmatpush3.msra.mxu1 %v588_v42 }
  0x9f   :  { %829 = vmatprep.subr.mxu1 %v603_v43 }
  0xa0   :  { %830 = vmatpush3.msra.mxu1 %v587_v44 }
  0xa1   :  { %831 = vmatprep.subr.mxu1 %v602_v45 }
  0xa2   :  { %832 = vmatpush3.msra.mxu1 %v586_v46 }
  0xa3   :  { %833 = vmatprep.subr.mxu1 %v601_v47 }
  0xa4   :  { %834 = vmatpush3.msra.mxu1 %v585_v48 }
  0xa5   :  { %835 = vmatprep.subr.mxu1 %v600_v49 }
  0xa6   :  { %836 = vmatpush3.msra.mxu1 %v584_v50 }
  0xa7   :  { %837 = vmatprep.subr.mxu1 %v599_v51 }
  0xa8   :  { %838 = vmatpush3.msra.mxu1 %v583_v52 }
  0xa9   :  { %839 = vmatprep.subr.mxu1 %v598_v53 }
  0xaa   :  { %840 = vmatpush3.msra.mxu1 %v582_v54 }
  0xab   :  { %841 = vmatprep.subr.mxu1 %v597_v55 }
  0xac   :  { %842 = vmatpush3.msra.mxu1 %v581_v56 }
  0xad   :  { %863 = vmatprep.subr.mxu1 %v959_v33 }
 0x10f   :  { %v361_v60 = vpop.f32.mrf.mxu0 }
 0x110   :  { %v362_v1 = vadd.f32 %v361_v60, %v244_v61 }
 0x111   :  { %v363_v63 = vpop.f32.mrf.mxu0 }
 0x112   :  { %v432_v0 = vpop.f32.mrf.mxu1  ;;  %v364_v2 = vadd.f32 %v363_v63, %v248_v62 }
 0x113   :  { %v433_v4 = vadd.f32 %v432_v0, %v362_v1 }
 0x114   :  { %v434_v3 = vpop.f32.mrf.mxu1 }
 0x115   :  { %v435_v7 = vadd.f32 %v434_v3, %v364_v2 }
 0x119   :  { %v574_v6 = vpop.f32.mrf.mxu1 }
 0x11b   :  { %v576_v12 = vpop.f32.mrf.mxu1 }
 0x150   :  { %v503_v5 = vpop.f32.mrf.mxu0 }
 0x151   :  { %v504_v8 = vadd.f32 %v503_v5, %v433_v4 }
 0x152   :  { %v505_v9 = vpop.f32.mrf.mxu0 }
 0x153   :  { %v506_v10 = vadd.f32 %v505_v9, %v435_v7  ;;  %v575_v11 = vadd.f32 %v574_v6, %v504_v8 }
 0x155   :  { %v577_v13 = vadd.f32 %v576_v12, %v506_v10  ;;  %v579_v38 = vmax.f32 %v575_v11, 0.0 }
 0x157   :  { %v580_v14 = vmax.f32 %v577_v13, 0.0 }
 0x159   :  { %684 = vmatprep.mubr.f32.mxu1 %v580_v14 }
 0x15a   :  { %685 = vmatmul.mubr.f32.vlgmr.msra.gmra.mxu1 %v579_v38 }
 0x15b   :  { %864 = vmatpush3.msra.mxu1 %v706_v15  ;;  %895 = vmatprep.mubr.msk.f32.mxu1 %vm960_vm1, %v959_v33 }
 0x15c   :  { %865 = vmatprep.subr.mxu1 %v959_v33 }
 0x15d   :  { %866 = vmatpush3.msra.mxu1 %v705_v16 }
 0x15e   :  { %867 = vmatprep.subr.mxu1 %v959_v33 }
 0x15f   :  { %868 = vmatpush3.msra.mxu1 %v704_v17 }
 0x160   :  { %869 = vmatprep.subr.mxu1 %v959_v33 }
 0x161   :  { %870 = vmatpush3.msra.mxu1 %v703_v19 }
 0x162   :  { %871 = vmatprep.subr.mxu1 %v959_v33 }
 0x163   :  { %872 = vmatpush3.msra.mxu1 %v702_v20 }
 0x164   :  { %873 = vmatprep.subr.mxu1 %v959_v33 }
 0x165   :  { %874 = vmatpush3.msra.mxu1 %v701_v21 }
 0x166   :  { %875 = vmatprep.subr.mxu1 %v959_v33 }
 0x167   :  { %876 = vmatpush3.msra.mxu1 %v700_v22 }
 0x168   :  { %877 = vmatprep.subr.mxu1 %v959_v33 }
 0x169   :  { %878 = vmatpush3.msra.mxu1 %v699_v23 }
 0x16a   :  { %879 = vmatprep.subr.mxu1 %v959_v33 }
 0x16b   :  { %880 = vmatpush3.msra.mxu1 %v698_v24 }
 0x16c   :  { %881 = vmatprep.subr.mxu1 %v959_v33 }
 0x16d   :  { %882 = vmatpush3.msra.mxu1 %v697_v25 }
 0x16e   :  { %883 = vmatprep.subr.mxu1 %v959_v33 }
 0x16f   :  { %884 = vmatpush3.msra.mxu1 %v696_v26 }
 0x170   :  { %885 = vmatprep.subr.mxu1 %v959_v33 }
 0x171   :  { %886 = vmatpush3.msra.mxu1 %v695_v27 }
 0x172   :  { %887 = vmatprep.subr.mxu1 %v959_v33 }
 0x173   :  { %888 = vmatpush3.msra.mxu1 %v694_v18 }
 0x174   :  { %889 = vmatprep.subr.mxu1 %v959_v33 }
 0x175   :  { %890 = vmatpush3.msra.mxu1 %v693_v28 }
 0x176   :  { %891 = vmatprep.subr.mxu1 %v959_v33 }
 0x177   :  { %892 = vmatpush3.msra.mxu1 %v692_v29 }
 0x178   :  { %893 = vmatprep.subr.mxu1 %v959_v33 }
 0x179   :  { %894 = vmatpush3.msra.mxu1 %v691_v30 }
 0x21a   :  { %v843_v31 = vpop.f32.mrf.mxu1 }
 0x21c   :  { %v844_v34 = vpop.f32.mrf.mxu1 }
 0x21d   :  { %v845_v35 = vadd.f32 %v844_v34, %v843_v31 }
 0x21f   :  { %v687_v36 = vadd.f32 %v845_v35, %v808_v32 }
 0x221   :  { %v690_v37 = vmax.f32 %v687_v36, 0.0 }
 0x223   :  { %896 = vmatmul.mubr.f32.vlgmr.msra.gmra.mxu1 %v690_v37 }
 0x2e3   :  { %v780_v40 = vpop.f32.mrf.mxu1 }
 0x2e4   :  { %v781_v41 = vadd.f32 %v809_v39, %v780_v40 }
 0x2e5   :  { %v897_v42 = vpop.f32.mrf.mxu1 }
 0x2e6   :  { %v810_v43 = vmul.f32 -1.442695, %v781_v41 }
 0x2e8   :  { %907 = vpow2.f32 %v810_v43 }
 0x2f5   :  { %v908_v33 = vpop.eup %907 }
 0x2f6   :  { %v787_v44 = vadd.f32 1.0, %v908_v33 }
 0x2f8   :  { %909 = vrcp.f32 %v787_v44 }
 0x305   :  { %v910_v45 = vpop.eup %909 }
 0x306   :  { %791 = vst.msk [vmem:[#allocation5] sm:$0x3] %vm790_vm2, %v910_v45 }
 0x307   :  { %942 = shalt.err (!%p939_p9)
}
 0x308   :  { %801 = dma.vmem_to_hbm [thread:$0]  %s799_s9, 32, %s1208_s7, [#allocation4]  }
 0x309   :  { %953 = dma.done.wait [#allocation4], 32  }
 0x30a   :  { %954 = vsyncadd [#allocation4], 4294967264 }
 0x30b   :  { %805 = vsyncpa [#allocation3], 1 }
 0x30c   :  { %806 = vsyncpa [#allocation4], 1 }

</bundles_post_ra>
